<compile_context>
chip_gen: v7x
topology: tpu7x:2x2x1
jax: 0.10.0
libtpu: 0.0.40
codegen_flags: <defaults>
</compile_context>

<pallas_src>
import math

import jax
import jax.numpy as jnp
from jax.experimental import pallas as pl
from jax.experimental.pallas import tpu as pltpu


def _read_unit_kernel(mem_in_ref, know_ref, ctrl_ref,
                      mem_w_ref, mem_b_ref,
                      cat_top_ref, cat_bot_ref, cat_b_ref,
                      attn_w_ref, attn_b_ref,
                      out_ref):
    know = know_ref[...]                                                    # (B, S, D)
    B, S, D = know.shape

    # mem = Linear_mem(memory[-1]) -- broadcast over knowledge positions later.
    mem = (jnp.dot(mem_in_ref[...], mem_w_ref[...],
                   preferred_element_type=jnp.float32) + mem_b_ref[...])    # (B, D)

    # "concat" linear without the concat: split-weight matmul sum on (B*S, D) slabs.
    know_flat = know.reshape(B * S, D)
    know_term = (jnp.dot(know_flat, cat_bot_ref[...],
                         preferred_element_type=jnp.float32)
                 + cat_b_ref[...])                                          # (B*S, D)
    mk = (know * mem[:, None, :]).reshape(B * S, D)                         # (B*S, D)
    concat = (jnp.dot(mk, cat_top_ref[...],
                      preferred_element_type=jnp.float32) + know_term)
    concat = concat.reshape(B, S, D)                                        # (B, S, D)

    # Attention logits: fold the (1, D) attn weight into control -> one lane contraction.
    ctrl_aw = ctrl_ref[...] * attn_w_ref[...]                               # (B, D)
    logit = jnp.einsum('bqd,bsd->bqs', ctrl_aw[:, None, :], concat,
                       preferred_element_type=jnp.float32)[:, 0, :]
    logit = logit + attn_b_ref[...]                                         # (B, S)

    # Softmax over the knowledge positions (EUP reciprocal for the denominator).
    logit = logit - jnp.max(logit, axis=-1, keepdims=True)
    e = jnp.exp(logit)
    attn = e * pl.reciprocal(jnp.sum(e, axis=-1, keepdims=True), approx=True)  # (B, S)

    # read = sum_s attn[b, s] * know[b, s, :]
    out_ref[...] = jnp.einsum('bqs,bsd->bqd', attn[:, None, :], know,
                              preferred_element_type=jnp.float32)[:, 0, :]  # (B, D)


def _xavier(key, shape, fan_in, fan_out):
    bound = math.sqrt(6.0 / (fan_in + fan_out))
    return jax.random.uniform(key, shape, jnp.float32, minval=-bound, maxval=bound)


def init_params(key, dim):
    D = dim
    k_mem, k_cat, k_attn = jax.random.split(key, 3)
    return dict(
        mem_w=_xavier(k_mem, (D, D), D, D),            # x @ W layout (in, out)
        mem_b=jnp.zeros((1, D), jnp.float32),
        cat_w=_xavier(k_cat, (2 * D, D), 2 * D, D),    # rows [:D] -> mem*know, [D:] -> know
        cat_b=jnp.zeros((1, D), jnp.float32),
        attn_w=_xavier(k_attn, (1, D), D, 1),          # (D -> 1) weight kept as a row-vector
        attn_b=jnp.zeros((1, 1), jnp.float32),
    )


def read_unit(memory_last, know, control_last, params):
    """ReadUnit forward.

    memory_last, control_last: (B, D) -- the `[-1]` entries of the PyTorch lists.
    know: (B, D, S) -- PyTorch layout (dim x knowledge positions).
    returns: read (B, D)
    """
    B, D, S = know.shape

    # Wrapper-side layout plumbing (free): contraction axis onto lanes, split concat weight.
    know_t = jnp.transpose(know, (0, 2, 1))            # (B, S, D)
    cat_top = params["cat_w"][:D]                      # multiplies mem * know
    cat_bot = params["cat_w"][D:]                      # multiplies know

    args = [
        memory_last, know_t, control_last,
        params["mem_w"], params["mem_b"],
        cat_top, cat_bot, params["cat_b"],
        params["attn_w"], params["attn_b"],
    ]
    return pl.pallas_call(
        _read_unit_kernel,
        out_shape=jax.ShapeDtypeStruct((B, D), jnp.float32),
        in_specs=[pl.BlockSpec(memory_space=pltpu.MemorySpace.VMEM)] * len(args),
        out_specs=pl.BlockSpec(memory_space=pltpu.MemorySpace.VMEM),
    )(*args)


def read_unit_reference(memory_last, know, control_last, params):
    """Pure-JAX reference mirroring the PyTorch forward (for correctness checking)."""
    mem = memory_last @ params["mem_w"] + params["mem_b"]                    # (B, D)
    mk = mem[:, :, None] * know                                              # (B, D, S)
    cat = jnp.concatenate([mk, know], axis=1)                                # (B, 2D, S)
    concat = jnp.einsum('bks,kd->bsd', cat, params["cat_w"]) + params["cat_b"]  # (B, S, D)
    attn_in = concat * control_last[:, None, :]                              # (B, S, D)
    logit = jnp.einsum('bsd,d->bs', attn_in, params["attn_w"][0]) + params["attn_b"][0, 0]
    attn = jax.nn.softmax(logit, axis=1)                                     # (B, S)
    return jnp.einsum('bs,bds->bd', attn, know)                              # (B, D)


if __name__ == "__main__":
    # S_KB a multiple of 8 so the in-kernel (B,S,D)<->(B*S,D) reshape is tile-aligned.
    B, D, S_KB = 2, 32, 16

    key = jax.random.PRNGKey(0)
    k_mem, k_know, k_ctrl, k_par = jax.random.split(key, 4)

    memory_last = jax.random.normal(k_mem, (B, D), jnp.float32)    # memory[-1]
    know = jax.random.normal(k_know, (B, D, S_KB), jnp.float32)    # PyTorch layout
    control_last = jax.random.normal(k_ctrl, (B, D), jnp.float32)  # control[-1]

    params = init_params(k_par, D)

    out = read_unit(memory_last, know, control_last, params)
    jax.block_until_ready(out)
    assert out.shape == (B, D)

    ref = read_unit_reference(memory_last, know, control_last, params)
    assert jnp.allclose(out, ref, atol=2e-2, rtol=2e-2), "mismatch vs pure-JAX reference"

    print("KERNEL_OK")
</pallas_src>

<mosaic_0001>
module attributes {stable_mosaic.version = 11 : i64} {
  func.func @_read_unit_kernel(%arg0: memref<2x32xf32, #tpu.memory_space<vmem>>, %arg1: memref<2x16x32xf32, #tpu.memory_space<vmem>>, %arg2: memref<2x32xf32, #tpu.memory_space<vmem>>, %arg3: memref<32x32xf32, #tpu.memory_space<vmem>>, %arg4: memref<1x32xf32, #tpu.memory_space<vmem>>, %arg5: memref<32x32xf32, #tpu.memory_space<vmem>>, %arg6: memref<32x32xf32, #tpu.memory_space<vmem>>, %arg7: memref<1x32xf32, #tpu.memory_space<vmem>>, %arg8: memref<1x32xf32, #tpu.memory_space<vmem>>, %arg9: memref<1x1xf32, #tpu.memory_space<vmem>>, %arg10: memref<2x32xf32, #tpu.memory_space<vmem>>) attributes {dimension_semantics = [], scalar_prefetch = 0 : i64, scratch_operands = 0 : i64, tpu.core_type = #tpu.core_type<tc>} {
    %c0 = arith.constant 0 : index
    %c0_0 = arith.constant 0 : index
    %c0_1 = arith.constant 0 : index
    %0 = vector.load %arg1[%c0, %c0_0, %c0_1] : memref<2x16x32xf32, #tpu.memory_space<vmem>>, vector<2x16x32xf32>
    %c0_2 = arith.constant 0 : index
    %c0_3 = arith.constant 0 : index
    %1 = vector.load %arg0[%c0_2, %c0_3] : memref<2x32xf32, #tpu.memory_space<vmem>>, vector<2x32xf32>
    %c0_4 = arith.constant 0 : index
    %c0_5 = arith.constant 0 : index
    %2 = vector.load %arg3[%c0_4, %c0_5] : memref<32x32xf32, #tpu.memory_space<vmem>>, vector<32x32xf32>
    %cst = arith.constant dense<0.000000e+00> : vector<2x32xf32>
    %3 = tpu.matmul %1, %2, %cst {dimension_numbers = #tpu.dot_dimension_numbers<[1], [0], [0], [1], [0, 0, 1, 1], [], []>} : vector<2x32xf32>, vector<32x32xf32>, vector<2x32xf32> -> vector<2x32xf32>
    %c0_6 = arith.constant 0 : index
    %c0_7 = arith.constant 0 : index
    %4 = vector.load %arg4[%c0_6, %c0_7] : memref<1x32xf32, #tpu.memory_space<vmem>>, vector<1x32xf32>
    %5 = vector.broadcast %4 : vector<1x32xf32> to vector<2x32xf32>
    %6 = arith.addf %3, %5 : vector<2x32xf32>
    %7 = vector.shape_cast %0 : vector<2x16x32xf32> to vector<32x32xf32>
    %c0_8 = arith.constant 0 : index
    %c0_9 = arith.constant 0 : index
    %8 = vector.load %arg6[%c0_8, %c0_9] : memref<32x32xf32, #tpu.memory_space<vmem>>, vector<32x32xf32>
    %cst_10 = arith.constant dense<0.000000e+00> : vector<32x32xf32>
    %9 = tpu.matmul %7, %8, %cst_10 {dimension_numbers = #tpu.dot_dimension_numbers<[1], [0], [0], [1], [0, 0, 1, 1], [], []>} : vector<32x32xf32>, vector<32x32xf32>, vector<32x32xf32> -> vector<32x32xf32>
    %c0_11 = arith.constant 0 : index
    %c0_12 = arith.constant 0 : index
    %10 = vector.load %arg7[%c0_11, %c0_12] : memref<1x32xf32, #tpu.memory_space<vmem>>, vector<1x32xf32>
    %11 = vector.broadcast %10 : vector<1x32xf32> to vector<32x32xf32>
    %12 = arith.addf %9, %11 : vector<32x32xf32>
    %13 = vector.shape_cast %6 : vector<2x32xf32> to vector<2x1x32xf32>
    %14 = vector.broadcast %13 : vector<2x1x32xf32> to vector<2x16x32xf32>
    %15 = arith.mulf %0, %14 : vector<2x16x32xf32>
    %16 = vector.shape_cast %15 : vector<2x16x32xf32> to vector<32x32xf32>
    %c0_13 = arith.constant 0 : index
    %c0_14 = arith.constant 0 : index
    %17 = vector.load %arg5[%c0_13, %c0_14] : memref<32x32xf32, #tpu.memory_space<vmem>>, vector<32x32xf32>
    %cst_15 = arith.constant dense<0.000000e+00> : vector<32x32xf32>
    %18 = tpu.matmul %16, %17, %cst_15 {dimension_numbers = #tpu.dot_dimension_numbers<[1], [0], [0], [1], [0, 0, 1, 1], [], []>} : vector<32x32xf32>, vector<32x32xf32>, vector<32x32xf32> -> vector<32x32xf32>
    %19 = arith.addf %18, %12 : vector<32x32xf32>
    %20 = vector.shape_cast %19 : vector<32x32xf32> to vector<2x16x32xf32>
    %c0_16 = arith.constant 0 : index
    %c0_17 = arith.constant 0 : index
    %21 = vector.load %arg2[%c0_16, %c0_17] : memref<2x32xf32, #tpu.memory_space<vmem>>, vector<2x32xf32>
    %c0_18 = arith.constant 0 : index
    %c0_19 = arith.constant 0 : index
    %22 = vector.load %arg8[%c0_18, %c0_19] : memref<1x32xf32, #tpu.memory_space<vmem>>, vector<1x32xf32>
    %23 = vector.broadcast %22 : vector<1x32xf32> to vector<2x32xf32>
    %24 = arith.mulf %21, %23 : vector<2x32xf32>
    %25 = vector.shape_cast %24 : vector<2x32xf32> to vector<2x1x32xf32>
    "tpu.trace_start"() <{level = 10 : i32, message = "bqd,bsd->bqs"}> : () -> ()
    %cst_20 = arith.constant dense<0.000000e+00> : vector<2x1x16xf32>
    %26 = tpu.matmul %25, %20, %cst_20 {dimension_numbers = #tpu.dot_dimension_numbers<[2], [2], [1], [1], [0, 0, 0, 1, 1, 1], [0], [0]>} : vector<2x1x32xf32>, vector<2x16x32xf32>, vector<2x1x16xf32> -> vector<2x1x16xf32>
    "tpu.trace_stop"() : () -> ()
    %27 = vector.shape_cast %26 : vector<2x1x16xf32> to vector<2x16xf32>
    %c0_21 = arith.constant 0 : index
    %c0_22 = arith.constant 0 : index
    %28 = vector.load %arg9[%c0_21, %c0_22] : memref<1x1xf32, #tpu.memory_space<vmem>>, vector<1x1xf32>
    %29 = vector.broadcast %28 : vector<1x1xf32> to vector<2x16xf32>
    %30 = arith.addf %27, %29 : vector<2x16xf32>
    %cst_23 = arith.constant dense<0xFF800000> : vector<2xf32>
    %31 = vector.multi_reduction <maximumf>, %30, %cst_23 [1] : vector<2x16xf32> to vector<2xf32>
    %32 = vector.shape_cast %31 : vector<2xf32> to vector<2x1xf32>
    %33 = vector.broadcast %32 : vector<2x1xf32> to vector<2x16xf32>
    %34 = arith.subf %30, %33 : vector<2x16xf32>
    %35 = math.exp %34 : vector<2x16xf32>
    %cst_24 = arith.constant dense<0.000000e+00> : vector<2xf32>
    %36 = vector.multi_reduction <add>, %35, %cst_24 [1] : vector<2x16xf32> to vector<2xf32>
    %37 = vector.shape_cast %36 : vector<2xf32> to vector<2x1xf32>
    %38 = tpu.reciprocal %37 {approx = true} : vector<2x1xf32> -> vector<2x1xf32>
    %39 = vector.broadcast %38 : vector<2x1xf32> to vector<2x16xf32>
    %40 = arith.mulf %35, %39 : vector<2x16xf32>
    %41 = vector.shape_cast %40 : vector<2x16xf32> to vector<2x1x16xf32>
    "tpu.trace_start"() <{level = 10 : i32, message = "bqs,bsd->bqd"}> : () -> ()
    %cst_25 = arith.constant dense<0.000000e+00> : vector<2x1x32xf32>
    %42 = tpu.matmul %41, %0, %cst_25 {dimension_numbers = #tpu.dot_dimension_numbers<[2], [1], [1], [2], [0, 0, 0, 1, 1, 2], [0], [0]>} : vector<2x1x16xf32>, vector<2x16x32xf32>, vector<2x1x32xf32> -> vector<2x1x32xf32>
    "tpu.trace_stop"() : () -> ()
    %43 = vector.shape_cast %42 : vector<2x1x32xf32> to vector<2x32xf32>
    %c0_26 = arith.constant 0 : index
    %c0_27 = arith.constant 0 : index
    %44 = vector.load %arg10[%c0_26, %c0_27] : memref<2x32xf32, #tpu.memory_space<vmem>>, vector<2x32xf32>
    tpu.vector_store %arg10[%c0_26, %c0_27], %43 {strides = array<i32>} : memref<2x32xf32, #tpu.memory_space<vmem>>, vector<2x32xf32>,
    return
  }
}

</mosaic_0001>

<bundles_post_ra>
// kernel: tpu_custom_call.1
= control target key start
LH: loop header
LB: loop body
LE: loop exit
PB: predicated region body
PF: predicated region fallthrough
CT: control target
= control target key end

     0   :  { %s1352_s0 = inlined_call_operand.vmem [shape: f32[2,32], index: 0, kind: input, shape index: {}]   ;;  %s1353_s1 = inlined_call_operand.hbm [shape: f32[2,16,32], index: 1, kind: input, shape index: {}]   ;;  %s1354_s2 = inlined_call_operand.vmem [shape: f32[2,32], index: 2, kind: input, shape index: {}]   ;;  %s1355_s3 = inlined_call_operand.hbm [shape: f32[32,32], index: 3, kind: input, shape index: {}]   ;;  %s1356_s4 = inlined_call_operand.vmem [shape: f32[1,32], index: 4, kind: input, shape index: {}]   ;;  %s1357_s5 = inlined_call_operand.hbm [shape: f32[32,32], index: 5, kind: input, shape index: {}]   ;;  %s1358_s6 = inlined_call_operand.hbm [shape: f32[32,32], index: 6, kind: input, shape index: {}]   ;;  %s1359_s7 = inlined_call_operand.vmem [shape: f32[1,32], index: 7, kind: input, shape index: {}]   ;;  %s1360_s8 = inlined_call_operand.vmem [shape: f32[1,32], index: 8, kind: input, shape index: {}]   ;;  %s1361_s9 = inlined_call_operand.<no memory space> [shape: f32[1,1], index: 9, kind: input, shape index: {}]   ;;  %s1362_s10 = inlined_call_operand.hbm [shape: f32[2,32], index: 10, kind: output, shape index: {}]  }
   0x1   :  { %v15_v0 = vstv %s1361_s9 }
   0x2   :  { %16 = vst [vmem:[#allocation2] sm:$0x1] %v15_v0 }
   0x3   :  { %17 = vsyncpa [#allocation4], 0 }
   0x4   :  { %18 = vsyncpa [#allocation7], 0 }
   0x5   :  { %19 = vsyncpa [#allocation10], 0 }
   0x6   :  { %20 = vsyncpa [#allocation5], 0  ;;  %s1137_s15 = smov [#allocation6]   ;;  %s1138_s17 = smov [#allocation3]  }
   0x7   :  { %s42_s16 = sshll.u32 %s1137_s15, 4  ;;  %s28_s18 = sshll.u32 %s1138_s17, 4  ;;  %s43_s16 = int_to_ptr.vmem [resolvable:$true] %s42_s16  ;;  %s1207_s18 = int_to_ptr.vmem [resolvable:$true] %s28_s18 }
   0x8   :  { %s1019_s21 = scalar_lea.hbm %s1355_s3, 512 }
   0x9   :  { %p1020_p0 = scmp.ne.s32.totalorder %s1355_s3, %s1019_s21  ;;  %p1023_p1 = scmp.lt.u32.totalorder %s1019_s21, %s1355_s3 }
   0xb   :  { %p1025_p2 = pnand %p1023_p1, %p1020_p0 }
   0xd   :  { %1028 = shalt.err (!%p1025_p2)
}
   0xe   :  { %s1029_s25 = scalar_lea.vmem %s43_s16, 512  ;;  %p1034_p4 = scmp.lt.s32.totalorder %s43_s16, %s43_s16 }
   0xf   :  { %p1030_p3 = scmp.ne.s32.totalorder %s43_s16, %s1029_s25  ;;  %p1035_p5 = scmp.lt.s32.totalorder %s1029_s25, %s1029_s25 }
  0x11   :  { %p1036_p6 = por %p1035_p5, %p1034_p4 }
  0x13   :  { %p1037_p7 = pnand %p1036_p6, %p1030_p3 }
  0x15   :  { %1040 = shalt.err (!%p1037_p7)
}
  0x16   :  { %s1139_s26 = smov 128   ;;  %s1140_s27 = smov 8  }
  0x17   :  { %48 = dma.hbm_to_vmem [thread:$0]  %s1355_s3, 512, %s43_s16, [#allocation7], %s1139_s26, %s1139_s26, %s1140_s27  }
  0x18   :  { %s1041_s12 = scalar_lea.hbm %s1353_s1, 512 }
  0x19   :  { %p1042_p8 = scmp.ne.s32.totalorder %s1353_s1, %s1041_s12  ;;  %p1045_p9 = scmp.lt.u32.totalorder %s1041_s12, %s1353_s1 }
  0x1b   :  { %p1047_p10 = pnand %p1045_p9, %p1042_p8 }
  0x1d   :  { %1050 = shalt.err (!%p1047_p10)
}
  0x1e   :  { %s1051_s19 = scalar_lea.vmem %s1207_s18, 512  ;;  %p1056_p12 = scmp.lt.s32.totalorder %s1207_s18, %s1207_s18 }
  0x1f   :  { %p1052_p11 = scmp.ne.s32.totalorder %s1207_s18, %s1051_s19  ;;  %p1057_p13 = scmp.lt.s32.totalorder %s1051_s19, %s1051_s19 }
  0x21   :  { %p1058_p0 = por %p1057_p13, %p1056_p12 }
  0x23   :  { %p1059_p1 = pnand %p1058_p0, %p1052_p11 }
  0x25   :  { %1062 = shalt.err (!%p1059_p1)
}
  0x26   :  { %34 = dma.hbm_to_vmem [thread:$0]  %s1353_s1, 512, %s1207_s18, [#allocation4], %s1139_s26, %s1139_s26, %s1140_s27  }
  0x27   :  { %s1141_s20 = smov [#allocation8]   ;;  %s1142_s22 = smov [#allocation9]  }
  0x28   :  { %s56_s21 = sshll.u32 %s1141_s20, 4  ;;  %s68_s23 = sshll.u32 %s1142_s22, 4  ;;  %s57_s21 = int_to_ptr.vmem [resolvable:$true] %s56_s21  ;;  %s1244_s23 = int_to_ptr.vmem [resolvable:$true] %s68_s23 }
  0x29   :  { %s1063_s25 = scalar_lea.hbm %s1357_s5, 512 }
  0x2a   :  { %p1064_p2 = scmp.ne.s32.totalorder %s1357_s5, %s1063_s25  ;;  %p1067_p3 = scmp.lt.u32.totalorder %s1063_s25, %s1357_s5 }
  0x2c   :  { %p1069_p4 = pnand %p1067_p3, %p1064_p2 }
  0x2e   :  { %1072 = shalt.err (!%p1069_p4)
}
  0x2f   :  { %s1073_s1 = scalar_lea.vmem %s57_s21, 512  ;;  %p1078_p6 = scmp.lt.s32.totalorder %s57_s21, %s57_s21 }
  0x30   :  { %p1074_p5 = scmp.ne.s32.totalorder %s57_s21, %s1073_s1  ;;  %p1079_p7 = scmp.lt.s32.totalorder %s1073_s1, %s1073_s1 }
  0x32   :  { %p1080_p8 = por %p1079_p7, %p1078_p6 }
  0x34   :  { %p1081_p9 = pnand %p1080_p8, %p1074_p5 }
  0x36   :  { %1084 = shalt.err (!%p1081_p9)
}
  0x37   :  { %62 = dma.hbm_to_vmem [thread:$0]  %s1357_s5, 512, %s57_s21, [#allocation7], %s1139_s26, %s1139_s26, %s1140_s27  }
  0x38   :  { %s1085_s15 = scalar_lea.hbm %s1358_s6, 512 }
  0x39   :  { %p1086_p10 = scmp.ne.s32.totalorder %s1358_s6, %s1085_s15  ;;  %p1089_p11 = scmp.lt.u32.totalorder %s1085_s15, %s1358_s6 }
  0x3b   :  { %p1091_p12 = pnand %p1089_p11, %p1086_p10 }
  0x3d   :  { %1094 = shalt.err (!%p1091_p12)
}
  0x3e   :  { %s1095_s20 = scalar_lea.vmem %s1244_s23, 512  ;;  %p1100_p0 = scmp.lt.s32.totalorder %s1244_s23, %s1244_s23 }
  0x3f   :  { %p1096_p13 = scmp.ne.s32.totalorder %s1244_s23, %s1095_s20  ;;  %p1101_p1 = scmp.lt.s32.totalorder %s1095_s20, %s1095_s20 }
  0x41   :  { %p1102_p2 = por %p1101_p1, %p1100_p0 }
  0x43   :  { %p1103_p3 = pnand %p1102_p2, %p1096_p13 }
  0x45   :  { %1106 = shalt.err (!%p1103_p3)
}
  0x46   :  { %74 = dma.hbm_to_vmem [thread:$0]  %s1358_s6, 512, %s1244_s23, [#allocation10], %s1139_s26, %s1139_s26, %s1140_s27  }
  0x47   :  { %1129 = dma.done.wait [#allocation4], 512  }
  0x48   :  { %1130 = vsyncadd [#allocation4], 4294966784 }
  0x49   :  { %1131 = dma.done.wait [#allocation7], 1024  }
  0x4a   :  { %1132 = vsyncadd [#allocation7], 4294966272 }
  0x4b   :  { %1133 = dma.done.wait [#allocation10], 512  }
  0x4c   :  { %1134 = vsyncadd [#allocation10], 4294966784  ;;  %v1143_v1 = vmov 0.0|0.0   ;;  %vm1144_vm0 = vmmov 0   ;;  %v1145_v2 = vmov 0.0   ;;  %v98_v3 = vld [vmem:[#allocation6] sm:$0xff]  ;;  %v295_v28 = vlaneseq }
  0x4d   :  { %956 = vmatprep.subr.bf16.mxu0 %v1143_v1  ;;  %897 = vmatprep.mubr.msk.f32.mxu0 %vm1144_vm0, %v1145_v2  ;;  %v99_v4 = vld [vmem:[#allocation6 + $0x8] sm:$0xff]  ;;  %v100_v5 = vld [vmem:[#allocation6 + $0x10] sm:$0xff]  ;;  %v101_v7 = vld [vmem:[#allocation6 + $0x18] sm:$0xff]  ;;  %vm109_vm1 = vcmask 261120   ;;  %v1146_v26 = vmov 1966171168  }
  0x4e   :  { %v957_v6 = vpack.c.bf16 %v99_v4, %v98_v3  ;;  %v183_v8 = vld [vmem:[#allocation9] sm:$0xff]  ;;  %v184_v9 = vld [vmem:[#allocation9 + $0x8] sm:$0xff]  ;;  %v185_v10 = vld [vmem:[#allocation9 + $0x10] sm:$0xff]  ;;  %v960_v12 = vpack.c.bf16 %v101_v7, %v100_v5  ;;  %v293_v27 = vunpack.c.l.s4 %v1146_v26  ;;  %v296_v30 = vshrl.u32 %v295_v28, 7 }
  0x4f   :  { %v186_v11 = vld [vmem:[#allocation9 + $0x18] sm:$0xff]  ;;  %v962_v13 = vpack.c.bf16 %v184_v9, %v183_v8  ;;  %v328_v16 = vld [vmem:[#allocation8] sm:$0xff]  ;;  %v329_v17 = vld [vmem:[#allocation8 + $0x8] sm:$0xff]  ;;  %v1147_v49 = vmov 0   ;;  %vm632_vm3 = vcmask 1041409   ;;  %vm635_vm4 = vcmask 123904  }
  0x50   :  { %958 = vmatpush3.bf16.msra.mxu0 %v957_v6  ;;  %v966_v14 = vpack.c.bf16 %v186_v11, %v185_v10  ;;  %v97_v15 = vld [vmem:[%s1352_s0] sm:$0x3]  ;;  %v970_v19 = vpack.c.bf16 %v329_v17, %v328_v16  ;;  %v94_v20 = vld [vmem:[#allocation3 + $0x8] sm:$0xff]  ;;  %v330_v21 = vld [vmem:[#allocation8 + $0x10] sm:$0xff]  ;;  %v294_v29 = vunpack.c.0.s8 %v293_v27  ;;  %v316_v37 = vsub.s32 0, %v296_v30  ;;  %1012 = vset.pattern.permute.xlu0 %v1147_v49 }
  0x51   :  { %959 = vmatprep.subr.bf16.mxu0 %v1143_v1  ;;  %963 = vmatprep.subr.bf16.mxu1 %v962_v13  ;;  %v93_v18 = vld [vmem:[#allocation3] sm:$0xff]  ;;  %v331_v22 = vld [vmem:[#allocation8 + $0x18] sm:$0xff]  ;;  %v1294_v23 = vld [vmem:[#allocation3 + $0x10] sm:$0xff]  ;;  %vm664_vm5 = vcmask 130048   ;;  %vm816_vm6 = vcmask 254976  }
  0x52   :  { %965 = vmatpush3.bf16.msra.mxu1 %v962_v13  ;;  %908 = vmatprep.mubr.msk.f32.mxu1 %vm109_vm1, %v93_v18  ;;  %v974_v24 = vpack.c.bf16 %v331_v22, %v330_v21  ;;  %v1298_v25 = vld [vmem:[#allocation3 + $0x18] sm:$0xff]  ;;  %v297_v32 = vsub.s32 %v294_v29, %v296_v30  ;;  %v987_v44 = vpack.c.bf16 %v94_v20, %v93_v18  ;;  %vm980_vm2 = vmpackc.low %vm109_vm1, %vm109_vm1 }
  0x53   :  { %967 = vmatprep.subr.bf16.mxu1 %v966_v14  ;;  %v835_v31 = vld [vmem:[%s1356_s4] ss:$0 sm:$0xff]  ;;  %v990_v6 = vpack.c.bf16 %v1298_v25, %v1294_v23 }
  0x54   :  { %961 = vmatpush3.bf16.msra.mxu0 %v960_v12  ;;  %v853_v48 = vld [vmem:[#allocation2] ss:$0 sm:$0xff] }
  0x55   :  { %978 = vmatprep.subr.bf16.mxu0 %v1143_v1  ;;  %624 = vperm.xlu0 %1012, %v853_v48   ;;  %v837_v50 = vld [vmem:[%s1359_s7] ss:$0 sm:$0xff] }
  0x56   :  { %969 = vmatpush3.bf16.msra.mxu1 %v966_v14  ;;  %v429_v51 = vld [vmem:[%s1354_s2] sm:$0x3]  ;;  %s1148_s2 = smov [#allocation11]  }
  0x57   :  { %898 = vmatmul.mubr.msk.f32.vlgmr.msra.gmra.mrb[0].mxu0 %vm109_vm1, %v97_v15  ;;  %971 = vmatprep.subr.bf16.mxu1 %v970_v19  ;;  %v846_v52 = vld [vmem:[%s1360_s8] ss:$0 sm:$0xff]  ;;  %s824_s7 = sshll.u32 %s1148_s2, 4  ;;  %s825_s7 = int_to_ptr.vmem [resolvable:$true] %s824_s7 }
  0x58   :  { %932 = vmatprep.mubr.msk.f32.mxu0 %vm1144_vm0, %v1145_v2  ;;  %v437_v56 = vmul.f32 %v846_v52, %v429_v51  ;;  %s1107_s8 = scalar_lea.vmem %s825_s7, 32  ;;  %p1112_p5 = scmp.lt.s32.totalorder %s825_s7, %s825_s7 }
  0x59   :  { %909 = vmatmul.mubr.msk.f32.vlgmr.msra.gmra.mrb[0].mxu1 %vm109_vm1, %v94_v20  ;;  %p1108_p4 = scmp.ne.s32.totalorder %s825_s7, %s1107_s8  ;;  %p1113_p6 = scmp.lt.s32.totalorder %s1107_s8, %s1107_s8 }
  0x5a   :  { %973 = vmatpush3.bf16.msra.mxu1 %v970_v19  ;;  %911 = vmatprep.mubr.msk.f32.mxu1 %vm109_vm1, %v1294_v23  ;;  %v445_v62 = vrot.slane %v437_v56, %v297_v32 }
  0x5b   :  { %975 = vmatprep.subr.bf16.mxu1 %v974_v24  ;;  %p1114_p7 = por %p1113_p6, %p1112_p5 }
  0x5c   :  { %v453_v3 = vrot.slane %v445_v62, %v297_v32  ;;  %v446_v4 = vcombine.high %v445_v62, %v445_v62 }
  0x5d   :  { %912 = vmatmul.mubr.msk.f32.gmra.mrb[2].mxu1 %vm109_vm1, %v1298_v25  ;;  %p1115_p8 = pnand %p1114_p7, %p1108_p4 }
  0x5e   :  { %977 = vmatpush3.bf16.msra.mxu1 %v974_v24  ;;  %v460_v5 = vrot.slane %v446_v4, %v297_v32 }
  0x5f   :  { %986 = vmatprep.subr.bf16.mxu1 %v1143_v1 }
  0xd4   :  { %v625_v9 = vpop.permute.xlu0 %624 }
 0x12a   :  { %v179_v33 = vpop.f32.mrb[0].mxu0 }
 0x12b   :  { %v180_v34 = vadd.f32 %v835_v31, %v179_v33  ;;  %v899_v35 = vpop.f32.mrb[1].mxu0 }
 0x12d   :  { %v298_v36 = vrot.slane %v180_v34, %v297_v32 }
 0x12f   :  { %v299_v38 = vcombine.high %v298_v36, %v298_v36  ;;  %v306_v39 = vrot.slane %v298_v36, %v297_v32 }
 0x131   :  { %v313_v40 = vrot.slane %v299_v38, %v297_v32  ;;  %v317_v41 = vrot.slane %v306_v39, %v316_v37 }
 0x133   :  { %v324_v42 = vmul.f32 %v317_v41, %v93_v18  ;;  %v325_v43 = vmul.f32 %v317_v41, %v94_v20  ;;  %v321_v45 = vrot.slane %v313_v40, %v316_v37 }
 0x135   :  { %v326_v46 = vmul.f32 %v321_v45, %v1294_v23  ;;  %922 = vmatprep.mubr.msk.f32.mxu1 %vm109_vm1, %v324_v42  ;;  %v327_v47 = vmul.f32 %v321_v45, %v1298_v25 }
 0x136   :  { %923 = vmatmul.mubr.msk.f32.vlgmr.msra.gmra.mrb[0].mxu1 %vm109_vm1, %v325_v43 }
 0x137   :  { %925 = vmatprep.mubr.msk.f32.mxu1 %vm109_vm1, %v326_v46  ;;  %988 = vmatpush3.bf16.msra.mxu1 %v987_v44 }
 0x13a   :  { %926 = vmatmul.mubr.msk.f32.gmra.mrb[2].mxu1 %vm109_vm1, %v327_v47 }
 0x13b   :  { %946 = vmatprep.mubr.msk.f32.mxu1 %vm1144_vm0, %v1145_v2 }
 0x209   :  { %v924_v53 = vpop.f32.mrb[0].mxu1 }
 0x20a   :  { %v992_v54 = vadd.f32 %v924_v53, %v837_v50  ;;  %v410_v55 = vpop.f32.mrb[1].mxu1 }
 0x20b   :  { %v993_v57 = vadd.f32 %v837_v50, %v410_v55 }
 0x20d   :  { %v979_v58 = vpack.c.bf16 %v992_v54, %v993_v57  ;;  %v927_v59 = vpop.f32.mrb[2].mxu1 }
 0x20e   :  { %v994_v60 = vadd.f32 %v927_v59, %v837_v50  ;;  %v420_v61 = vpop.f32.mrb[3].mxu1 }
 0x20f   :  { %v995_v63 = vadd.f32 %v837_v50, %v420_v61  ;;  %981 = vmatpush3.bf16.xpose.msk.msra.mxu0 %vm980_vm2, %v979_v58 }
 0x210   :  { %982 = vmatprep.subr.bf16.mxu0 %v1143_v1 }
 0x211   :  { %v983_v0 = vpack.c.bf16 %v994_v60, %v995_v63 }
 0x216   :  { %933 = vmatmul.mubr.msk.f32.vlgmr.msra.gmra.mrb[2].mxu0 %vm109_vm1, %v453_v3 }
 0x217   :  { %985 = vmatpush3.bf16.xpose.msk.msra.mxu0 %vm980_vm2, %v983_v0  ;;  %939 = vmatprep.mubr.msk.f32.mxu0 %vm1144_vm0, %v1145_v2 }
 0x218   :  { %989 = vmatprep.subr.bf16.mxu0 %v1143_v1 }
 0x21e   :  { %940 = vmatmul.mubr.msk.f32.vlgmr.msra.gmra.mrb[4].mxu0 %vm109_vm1, %v460_v5 }
 0x21f   :  { %991 = vmatpush3.bf16.msra.mxu0 %v990_v6  ;;  %953 = vmatprep.mubr.msk.f32.mxu0 %vm1144_vm0, %v1145_v2 }
 0x2e9   :  { %v535_v7 = vpop.f32.mrb[2].mxu0 }
 0x2ea   :  { %v934_v8 = vpop.f32.mrb[3].mxu0  ;;  %v627_v13 = vadd.f32 %v625_v9, %v535_v7 }
 0x2f1   :  { %v613_v10 = vpop.f32.mrb[4].mxu0 }
 0x2f2   :  { %v628_v11 = vadd.f32 %v625_v9, %v613_v10  ;;  %v941_v12 = vpop.f32.mrb[5].mxu0 }
 0x2f4   :  { %v631_v14 = vrot.slane %v628_v11, 7 }
 0x2f6   :  { %v633_v1 = vsel %vm632_vm3, %v631_v14, %v627_v13 }
 0x2f7   :  { %v636_v15 = vsel %vm635_vm4, %v633_v1, -inf }
 0x2f8   :  { %637 = vmax.xlane.f32.xlu0 %v636_v15 }
 0x385   :  { %v638_v16 = vpop.xlane.xlu0 %637 }
 0x386   :  { %v640_v17 = vrot.slane %v638_v16, 1  ;;  %v643_v18 = vsub.f32 %v627_v13, %v638_v16 }
 0x388   :  { %v644_v19 = vsub.f32 %v628_v11, %v640_v17  ;;  %v645_v2 = vmul.f32 1.442695, %v643_v18 }
 0x38a   :  { %v647_v20 = vmul.f32 1.442695, %v644_v19 }
 0x38c   :  { %1013 = vpow2.f32 %v647_v20 }
 0x38d   :  { %1015 = vpow2.f32 %v645_v2 }
 0x396   :  { %v1014_v21 = vpop.eup %1013 }
 0x397   :  { %v651_v22 = vrot.slane %v1014_v21, 7  ;;  %v1016_v23 = vpop.eup %1015 }
 0x399   :  { %v652_v24 = vsel %vm632_vm3, %v651_v22, %v1016_v23 }
 0x39a   :  { %v654_v25 = vsel %vm635_vm4, %v652_v24, 0.0 }
 0x39b   :  { %655 = vadd.xlane.f32.xlu1 %v654_v25 }
 0x428   :  { %v656_v26 = vpop.xlane.xlu1 %655 }
 0x429   :  { %1017 = vrcp.f32 %v656_v26 }
 0x433   :  { %v1018_v27 = vpop.eup %1017 }
 0x434   :  { %v659_v28 = vrot.slane %v1018_v27, 1  ;;  %v662_v29 = vmul.f32 %v1018_v27, %v1016_v23 }
 0x436   :  { %947 = vmatmul.mubr.msk.f32.vlgmr.msra.gmra.mrb[4].mxu1 %vm664_vm5, %v662_v29  ;;  %v663_v30 = vmul.f32 %v1014_v21, %v659_v28 }
 0x438   :  { %954 = vmatmul.mubr.msk.f32.vlgmr.msra.gmra.mrb[6].mxu0 %vm664_vm5, %v663_v30 }
 0x509   :  { %v734_v31 = vpop.f32.mrb[4].mxu1 }
 0x50a   :  { %v948_v32 = vpop.f32.mrb[5].mxu1 }
 0x50b   :  { %v807_v33 = vpop.f32.mrb[6].mxu0 }
 0x50c   :  { %v813_v34 = vrot.slane %v807_v33, 7  ;;  %v955_v35 = vpop.f32.mrb[7].mxu0 }
 0x50e   :  { %v814_v36 = vsel %vm632_vm3, %v813_v34, %v734_v31 }
 0x50f   :  { %817 = vst.msk [vmem:[#allocation11] sm:$0x3] %vm816_vm6, %v814_v36 }
 0x510   :  { %1118 = shalt.err (!%p1115_p8)
}
 0x511   :  { %s1119_s30 = scalar_lea.hbm %s1362_s10, 32 }
 0x512   :  { %p1120_p9 = scmp.ne.s32.totalorder %s1362_s10, %s1119_s30  ;;  %p1123_p10 = scmp.lt.u32.totalorder %s1119_s30, %s1362_s10 }
 0x514   :  { %p1125_p11 = pnand %p1123_p10, %p1120_p9 }
 0x516   :  { %1128 = shalt.err (!%p1125_p11)
}
 0x517   :  { %827 = dma.vmem_to_hbm [thread:$0]  %s825_s7, 32, %s1362_s10, [#allocation5]  }
 0x518   :  { %1135 = dma.done.wait [#allocation5], 32  }
 0x519   :  { %1136 = vsyncadd [#allocation5], 4294967264 }
 0x51a   :  { %831 = vsyncpa [#allocation4], 1 }
 0x51b   :  { %832 = vsyncpa [#allocation7], 1 }
 0x51c   :  { %833 = vsyncpa [#allocation10], 1 }
 0x51d   :  { %834 = vsyncpa [#allocation5], 1 }

</bundles_post_ra>
